<compile_context>
chip_gen: v7x
topology: tpu7x:2x2x1
jax: 0.10.0
libtpu: 0.0.40
codegen_flags: <defaults>
</compile_context>

<pallas_src>
import math

import jax
import jax.numpy as jnp
from jax.experimental import pallas as pl
from jax.experimental.pallas import tpu as pltpu


_SOFTPLUS_BIAS = math.log(math.expm1(1.0))   # inverse_softplus(1.0) (biased_softplus_1.0)
_SCALE_LB = 1e-4
_LANE = 128


def _round_up(n, m):
    return ((n + m - 1) // m) * m


def _softplus(x):
    # Single-branch numerically stable softplus: max(x,0) + log1p(exp(-|x|))
    return jnp.maximum(x, 0.0) + jnp.log1p(jnp.exp(-jnp.abs(x)))


# -------------------- Pallas kernel --------------------

def actor_mlp_kernel(x_ref,
                     w1_ref, b1_ref,
                     w2_ref, b2_ref,
                     w3l_ref, b3l_ref,
                     w3s_ref, b3s_ref,
                     loc_ref, scale_ref):
    x = x_ref[...]                                                  # [TB, D] (compute dtype)

    # Linear 1 + Tanh  (accumulate f32; tanh in f32 for v5e safety)
    h = jnp.dot(x, w1_ref[...], preferred_element_type=jnp.float32)
    h = jnp.tanh(h + b1_ref[...])                                   # [TB, H1] f32
    h = h.astype(w2_ref.dtype)

    # Linear 2 + Tanh
    h = jnp.dot(h, w2_ref[...], preferred_element_type=jnp.float32)
    h = jnp.tanh(h + b2_ref[...])                                   # [TB, H2] f32
    h = h.astype(w3l_ref.dtype)

    # Final layer, pre-split heads (already lane-padded to 128 in the wrapper),
    # so both matmuls and both output stores are full unmasked 128-lane tiles.
    loc = jnp.dot(h, w3l_ref[...], preferred_element_type=jnp.float32) + b3l_ref[...]
    s_raw = jnp.dot(h, w3s_ref[...], preferred_element_type=jnp.float32) + b3s_ref[...]

    # NormalParamExtractor scale head (softplus bias already folded into b3s).
    scale = jnp.maximum(_softplus(s_raw), _SCALE_LB)

    loc_ref[...] = loc.astype(loc_ref.dtype)
    scale_ref[...] = scale.astype(scale_ref.dtype)


# -------------------- Wrapper --------------------

def actor_forward(x, params, *, compute_dtype=jnp.float32, row_tile=256):
    """Fused actor MLP forward. Returns (loc, scale) like torchrl's actor head."""
    (w1, b1), (w2, b2), (w3, b3) = params
    B, D = x.shape
    A = w3.shape[1] // 2

    # Pre-split the final layer + fold the softplus bias into the scale bias.
    w3_loc, w3_scale = w3[:, :A], w3[:, A:]
    b3_loc = b3[:, :A]
    b3_scale = b3[:, A:] + _SOFTPLUS_BIAS

    # Zero-pad the head columns to a full 128-lane tile so the kernel's output
    # stores are unmasked lane-dense `vst` (garbage lanes are sliced off below).
    Ap = _round_up(A, _LANE)
    if Ap != A:
        pad = ((0, 0), (0, Ap - A))
        w3_loc = jnp.pad(w3_loc, pad)
        w3_scale = jnp.pad(w3_scale, pad)
        b3_loc = jnp.pad(b3_loc, pad)
        b3_scale = jnp.pad(b3_scale, pad)

    # MXU input dtype (bf16 recommended on v6e/v7x; f32 default keeps tight numerics).
    w1c = w1.astype(compute_dtype)
    w2c = w2.astype(compute_dtype)
    w3l = w3_loc.astype(compute_dtype)
    w3s = w3_scale.astype(compute_dtype)

    # Row tiling: pick the number of tiles first, then the smallest 8-aligned
    # tile that covers B, so ragged batches pad minimally (e.g. 300 -> 304,
    # not 512).  Per-step VMEM footprint stays tiny vs the v7x 64 MiB budget.
    num_tiles = -(-B // row_tile)
    tb = _round_up(-(-B // num_tiles), 8)
    Bp = num_tiles * tb
    if Bp != B:
        x = jnp.pad(x, ((0, Bp - B), (0, 0)))
    xc = x.astype(compute_dtype)

    grid = (num_tiles,)

    def row_spec(cols):
        return pl.BlockSpec((tb, cols), lambda i: (i, 0))

    def resident(arr):
        # Same block index every grid step -> fetched once, stays VMEM-resident.
        return pl.BlockSpec(arr.shape, lambda i: (0, 0))

    loc, scale = pl.pallas_call(
        actor_mlp_kernel,
        out_shape=(
            jax.ShapeDtypeStruct((Bp, Ap), jnp.float32),
            jax.ShapeDtypeStruct((Bp, Ap), jnp.float32),
        ),
        grid=grid,
        in_specs=[
            row_spec(D),
            resident(w1c), resident(b1),
            resident(w2c), resident(b2),
            resident(w3l), resident(b3_loc),
            resident(w3s), resident(b3_scale),
        ],
        out_specs=(row_spec(Ap), row_spec(Ap)),
        compiler_params=pltpu.CompilerParams(
            dimension_semantics=("parallel",)),
    )(xc, w1c, b1, w2c, b2, w3l, b3_loc, w3s, b3_scale)

    return loc[:B, :A], scale[:B, :A]


def init_actor_params(key, dimentions):
    """Deterministic Linear params for actor_dimentions.

    PyTorch Linear stores weight [out, in]; we return it pre-transposed to
    [in, out] so the kernel computes x @ W + b.  Bias kept 2-D [1, out].
    """
    params = []
    for n_in, n_out in zip(dimentions[:-1], dimentions[1:]):
        key, kw, kb = jax.random.split(key, 3)
        bound = 1.0 / math.sqrt(n_in)           # PyTorch default Linear init range
        w = jax.random.uniform(kw, (n_in, n_out), jnp.float32, -bound, bound)
        b = jax.random.uniform(kb, (1, n_out), jnp.float32, -bound, bound)
        params.append((w, b))
    return params


# -------------------- Pure-JAX reference --------------------

def actor_forward_ref(x, params):
    h = x
    for (w, b) in params[:-1]:
        h = jnp.tanh(h @ w + b)
    w, b = params[-1]
    out = h @ w + b
    a = out.shape[-1] // 2
    loc, scale_raw = out[:, :a], out[:, a:]
    scale = jnp.maximum(jax.nn.softplus(scale_raw + _SOFTPLUS_BIAS), _SCALE_LB)
    return loc, scale


# -------------------- Main --------------------

if __name__ == "__main__":
    key = jax.random.PRNGKey(0)

    # actor_dimentions = [obs_dim, hidden, hidden, 2 * action_dim]
    obs_dim, hidden, action_dim = 32, 64, 4
    dims = [obs_dim, hidden, hidden, 2 * action_dim]

    kx, kp, kx2 = jax.random.split(key, 3)
    params = init_actor_params(kp, dims)

    # --- small batch, f32 compute: strict correctness check ---
    batch = 8
    x = jax.random.normal(kx, (batch, obs_dim), jnp.float32)
    loc, scale = actor_forward(x, params)
    jax.block_until_ready((loc, scale))

    loc_ref, scale_ref = actor_forward_ref(x, params)
    assert loc.shape == (batch, action_dim) and scale.shape == (batch, action_dim)
    assert jnp.allclose(loc, loc_ref, atol=1e-5, rtol=1e-5)
    assert jnp.allclose(scale, scale_ref, atol=1e-5, rtol=1e-5)
    assert bool(jnp.all(scale > 0.0))

    # --- larger (non-multiple) batch exercises the row grid + padding path ---
    big_batch = 300
    xb = jax.random.normal(kx2, (big_batch, obs_dim), jnp.float32)
    loc_b, scale_b = actor_forward(xb, params)
    jax.block_until_ready((loc_b, scale_b))
    loc_bref, scale_bref = actor_forward_ref(xb, params)
    assert loc_b.shape == (big_batch, action_dim)
    assert jnp.allclose(loc_b, loc_bref, atol=1e-4, rtol=1e-4)
    assert jnp.allclose(scale_b, scale_bref, atol=1e-4, rtol=1e-4)

    # --- bf16 MXU path (v6e/v7x recommended); relaxed tolerance ---
    loc_h, scale_h = actor_forward(xb, params, compute_dtype=jnp.bfloat16)
    jax.block_until_ready((loc_h, scale_h))
    assert jnp.allclose(loc_h, loc_bref, atol=5e-2, rtol=5e-2)
    assert jnp.allclose(scale_h, scale_bref, atol=5e-2, rtol=5e-2)

    # TODO(synk): ProbabilisticActor / TanhNormal sampling + log_prob are
    # distribution-level wrappers outside the nn.Module hot path; not ported.
    print("KERNEL_OK")
</pallas_src>

<mosaic_0001>
module attributes {stable_mosaic.version = 11 : i64} {
  func.func @actor_mlp_kernel(%arg0: i32, %arg1: memref<8x32xf32, #tpu.memory_space<vmem>>, %arg2: memref<32x64xf32, #tpu.memory_space<vmem>>, %arg3: memref<1x64xf32, #tpu.memory_space<vmem>>, %arg4: memref<64x64xf32, #tpu.memory_space<vmem>>, %arg5: memref<1x64xf32, #tpu.memory_space<vmem>>, %arg6: memref<64x128xf32, #tpu.memory_space<vmem>>, %arg7: memref<1x128xf32, #tpu.memory_space<vmem>>, %arg8: memref<64x128xf32, #tpu.memory_space<vmem>>, %arg9: memref<1x128xf32, #tpu.memory_space<vmem>>, %arg10: memref<8x128xf32, #tpu.memory_space<vmem>>, %arg11: memref<8x128xf32, #tpu.memory_space<vmem>>) attributes {dimension_semantics = [#tpu.dimension_semantics<parallel>], iteration_bounds = array<i64: 1>, scalar_prefetch = 0 : i64, scratch_operands = 0 : i64, tpu.core_type = #tpu.core_type<tc>, window_params = [{transform_indices = @transform_0, window_bounds = array<i64: 8, 32>}, {pipeline_mode = #tpu.pipeline_mode<synchronous>, transform_indices = @transform_1, window_bounds = array<i64: 32, 64>}, {pipeline_mode = #tpu.pipeline_mode<synchronous>, transform_indices = @transform_2, window_bounds = array<i64: 1, 64>}, {pipeline_mode = #tpu.pipeline_mode<synchronous>, transform_indices = @transform_3, window_bounds = array<i64: 64, 64>}, {pipeline_mode = #tpu.pipeline_mode<synchronous>, transform_indices = @transform_4, window_bounds = array<i64: 1, 64>}, {pipeline_mode = #tpu.pipeline_mode<synchronous>, transform_indices = @transform_5, window_bounds = array<i64: 64, 128>}, {pipeline_mode = #tpu.pipeline_mode<synchronous>, transform_indices = @transform_6, window_bounds = array<i64: 1, 128>}, {pipeline_mode = #tpu.pipeline_mode<synchronous>, transform_indices = @transform_7, window_bounds = array<i64: 64, 128>}, {pipeline_mode = #tpu.pipeline_mode<synchronous>, transform_indices = @transform_8, window_bounds = array<i64: 1, 128>}, {transform_indices = @transform_9, window_bounds = array<i64: 8, 128>}, {transform_indices = @transform_10, window_bounds = array<i64: 8, 128>}]} {
    %c0 = arith.constant 0 : index
    %c0_0 = arith.constant 0 : index
    %0 = vector.load %arg1[%c0, %c0_0] : memref<8x32xf32, #tpu.memory_space<vmem>>, vector<8x32xf32>
    %c0_1 = arith.constant 0 : index
    %c0_2 = arith.constant 0 : index
    %1 = vector.load %arg2[%c0_1, %c0_2] : memref<32x64xf32, #tpu.memory_space<vmem>>, vector<32x64xf32>
    %cst = arith.constant dense<0.000000e+00> : vector<8x64xf32>
    %2 = tpu.matmul %0, %1, %cst {dimension_numbers = #tpu.dot_dimension_numbers<[1], [0], [0], [1], [0, 0, 1, 1], [], []>} : vector<8x32xf32>, vector<32x64xf32>, vector<8x64xf32> -> vector<8x64xf32>
    %c0_3 = arith.constant 0 : index
    %c0_4 = arith.constant 0 : index
    %3 = vector.load %arg3[%c0_3, %c0_4] : memref<1x64xf32, #tpu.memory_space<vmem>>, vector<1x64xf32>
    %4 = vector.broadcast %3 : vector<1x64xf32> to vector<8x64xf32>
    %5 = arith.addf %2, %4 : vector<8x64xf32>
    %6 = math.tanh %5 : vector<8x64xf32>
    %c0_5 = arith.constant 0 : index
    %c0_6 = arith.constant 0 : index
    %7 = vector.load %arg4[%c0_5, %c0_6] : memref<64x64xf32, #tpu.memory_space<vmem>>, vector<64x64xf32>
    %cst_7 = arith.constant dense<0.000000e+00> : vector<8x64xf32>
    %8 = tpu.matmul %6, %7, %cst_7 {dimension_numbers = #tpu.dot_dimension_numbers<[1], [0], [0], [1], [0, 0, 1, 1], [], []>} : vector<8x64xf32>, vector<64x64xf32>, vector<8x64xf32> -> vector<8x64xf32>
    %c0_8 = arith.constant 0 : index
    %c0_9 = arith.constant 0 : index
    %9 = vector.load %arg5[%c0_8, %c0_9] : memref<1x64xf32, #tpu.memory_space<vmem>>, vector<1x64xf32>
    %10 = vector.broadcast %9 : vector<1x64xf32> to vector<8x64xf32>
    %11 = arith.addf %8, %10 : vector<8x64xf32>
    %12 = math.tanh %11 : vector<8x64xf32>
    %c0_10 = arith.constant 0 : index
    %c0_11 = arith.constant 0 : index
    %13 = vector.load %arg6[%c0_10, %c0_11] : memref<64x128xf32, #tpu.memory_space<vmem>>, vector<64x128xf32>
    %cst_12 = arith.constant dense<0.000000e+00> : vector<8x128xf32>
    %14 = tpu.matmul %12, %13, %cst_12 {dimension_numbers = #tpu.dot_dimension_numbers<[1], [0], [0], [1], [0, 0, 1, 1], [], []>} : vector<8x64xf32>, vector<64x128xf32>, vector<8x128xf32> -> vector<8x128xf32>
    %c0_13 = arith.constant 0 : index
    %c0_14 = arith.constant 0 : index
    %15 = vector.load %arg7[%c0_13, %c0_14] : memref<1x128xf32, #tpu.memory_space<vmem>>, vector<1x128xf32>
    %16 = vector.broadcast %15 : vector<1x128xf32> to vector<8x128xf32>
    %17 = arith.addf %14, %16 : vector<8x128xf32>
    %c0_15 = arith.constant 0 : index
    %c0_16 = arith.constant 0 : index
    %18 = vector.load %arg8[%c0_15, %c0_16] : memref<64x128xf32, #tpu.memory_space<vmem>>, vector<64x128xf32>
    %cst_17 = arith.constant dense<0.000000e+00> : vector<8x128xf32>
    %19 = tpu.matmul %12, %18, %cst_17 {dimension_numbers = #tpu.dot_dimension_numbers<[1], [0], [0], [1], [0, 0, 1, 1], [], []>} : vector<8x64xf32>, vector<64x128xf32>, vector<8x128xf32> -> vector<8x128xf32>
    %c0_18 = arith.constant 0 : index
    %c0_19 = arith.constant 0 : index
    %20 = vector.load %arg9[%c0_18, %c0_19] : memref<1x128xf32, #tpu.memory_space<vmem>>, vector<1x128xf32>
    %21 = vector.broadcast %20 : vector<1x128xf32> to vector<8x128xf32>
    %22 = arith.addf %19, %21 : vector<8x128xf32>
    %cst_20 = arith.constant 0.000000e+00 : f32
    %23 = vector.broadcast %cst_20 : f32 to vector<8x128xf32>
    %24 = arith.maximumf %22, %23 : vector<8x128xf32>
    %25 = math.absf %22 : vector<8x128xf32>
    %cst_21 = arith.constant 0.000000e+00 : f32
    %26 = vector.broadcast %cst_21 : f32 to vector<8x128xf32>
    %27 = arith.subf %26, %25 : vector<8x128xf32>
    %28 = math.exp %27 : vector<8x128xf32>
    %29 = math.log1p %28 : vector<8x128xf32>
    %30 = arith.addf %24, %29 : vector<8x128xf32>
    %cst_22 = arith.constant 9.99999974E-5 : f32
    %31 = vector.broadcast %cst_22 : f32 to vector<8x128xf32>
    %32 = arith.maximumf %30, %31 : vector<8x128xf32>
    %c0_23 = arith.constant 0 : index
    %c0_24 = arith.constant 0 : index
    %33 = vector.load %arg10[%c0_23, %c0_24] : memref<8x128xf32, #tpu.memory_space<vmem>>, vector<8x128xf32>
    tpu.vector_store %arg10[%c0_23, %c0_24], %17 {strides = array<i32>} : memref<8x128xf32, #tpu.memory_space<vmem>>, vector<8x128xf32>,
    %c0_25 = arith.constant 0 : index
    %c0_26 = arith.constant 0 : index
    %34 = vector.load %arg11[%c0_25, %c0_26] : memref<8x128xf32, #tpu.memory_space<vmem>>, vector<8x128xf32>
    tpu.vector_store %arg11[%c0_25, %c0_26], %32 {strides = array<i32>} : memref<8x128xf32, #tpu.memory_space<vmem>>, vector<8x128xf32>,
    return
  }
  func.func @transform_0(%arg0: i32) -> (i32, i32) {
    %c0_i32 = arith.constant 0 : i32
    %c0_i32_0 = arith.constant 0 : i32
    return %arg0, %c0_i32 : i32, i32
  }
  func.func @transform_1(%arg0: i32) -> (i32, i32) {
    %c0_i32 = arith.constant 0 : i32
    %c0_i32_0 = arith.constant 0 : i32
    %c0_i32_1 = arith.constant 0 : i32
    return %c0_i32, %c0_i32_0 : i32, i32
  }
  func.func @transform_2(%arg0: i32) -> (i32, i32) {
    %c0_i32 = arith.constant 0 : i32
    %c0_i32_0 = arith.constant 0 : i32
    %c0_i32_1 = arith.constant 0 : i32
    return %c0_i32, %c0_i32_0 : i32, i32
  }
  func.func @transform_3(%arg0: i32) -> (i32, i32) {
    %c0_i32 = arith.constant 0 : i32
    %c0_i32_0 = arith.constant 0 : i32
    %c0_i32_1 = arith.constant 0 : i32
    return %c0_i32, %c0_i32_0 : i32, i32
  }
  func.func @transform_4(%arg0: i32) -> (i32, i32) {
    %c0_i32 = arith.constant 0 : i32
    %c0_i32_0 = arith.constant 0 : i32
    %c0_i32_1 = arith.constant 0 : i32
    return %c0_i32, %c0_i32_0 : i32, i32
  }
  func.func @transform_5(%arg0: i32) -> (i32, i32) {
    %c0_i32 = arith.constant 0 : i32
    %c0_i32_0 = arith.constant 0 : i32
    %c0_i32_1 = arith.constant 0 : i32
    return %c0_i32, %c0_i32_0 : i32, i32
  }
  func.func @transform_6(%arg0: i32) -> (i32, i32) {
    %c0_i32 = arith.constant 0 : i32
    %c0_i32_0 = arith.constant 0 : i32
    %c0_i32_1 = arith.constant 0 : i32
    return %c0_i32, %c0_i32_0 : i32, i32
  }
  func.func @transform_7(%arg0: i32) -> (i32, i32) {
    %c0_i32 = arith.constant 0 : i32
    %c0_i32_0 = arith.constant 0 : i32
    %c0_i32_1 = arith.constant 0 : i32
    return %c0_i32, %c0_i32_0 : i32, i32
  }
  func.func @transform_8(%arg0: i32) -> (i32, i32) {
    %c0_i32 = arith.constant 0 : i32
    %c0_i32_0 = arith.constant 0 : i32
    %c0_i32_1 = arith.constant 0 : i32
    return %c0_i32, %c0_i32_0 : i32, i32
  }
  func.func @transform_9(%arg0: i32) -> (i32, i32) {
    %c0_i32 = arith.constant 0 : i32
    %c0_i32_0 = arith.constant 0 : i32
    return %arg0, %c0_i32 : i32, i32
  }
  func.func @transform_10(%arg0: i32) -> (i32, i32) {
    %c0_i32 = arith.constant 0 : i32
    %c0_i32_0 = arith.constant 0 : i32
    return %arg0, %c0_i32 : i32, i32
  }
}

</mosaic_0001>

<bundles_post_ra>
// kernel: tpu_custom_call.1
= control target key start
LH: loop header
LB: loop body
LE: loop exit
PB: predicated region body
PF: predicated region fallthrough
CT: control target
= control target key end

     0   :  { %16 = vsyncpa [#allocation3], 0  ;;  %s1031_s0 = inlined_call_operand.hbm [shape: f32[8,32], index: 0, kind: input, shape index: {}]   ;;  %s1032_s1 = inlined_call_operand.hbm [shape: f32[32,64], index: 1, kind: input, shape index: {}]   ;;  %s1033_s2 = inlined_call_operand.vmem [shape: f32[1,64], index: 2, kind: input, shape index: {}]   ;;  %s1034_s3 = inlined_call_operand.hbm [shape: f32[64,64], index: 3, kind: input, shape index: {}]   ;;  %s1035_s4 = inlined_call_operand.vmem [shape: f32[1,64], index: 4, kind: input, shape index: {}]   ;;  %s1036_s5 = inlined_call_operand.hbm [shape: f32[64,128], index: 5, kind: input, shape index: {}]   ;;  %s1037_s6 = inlined_call_operand.vmem [shape: f32[1,128], index: 6, kind: input, shape index: {}]   ;;  %s1038_s7 = inlined_call_operand.hbm [shape: f32[64,128], index: 7, kind: input, shape index: {}]   ;;  %s1039_s8 = inlined_call_operand.vmem [shape: f32[1,128], index: 8, kind: input, shape index: {}]   ;;  %s1040_s9 = inlined_call_operand.hbm [shape: f32[8,128], index: 9, kind: output, shape index: {0}]   ;;  %s1041_s10 = inlined_call_operand.hbm [shape: f32[8,128], index: 10, kind: output, shape index: {1}]  }
   0x1   :  { %17 = vsyncpa [#allocation6], 0 }
   0x2   :  { %18 = vsyncpa [#allocation9], 0 }
   0x3   :  { %19 = vsyncpa [#allocation4], 0 }
   0x4   :  { %20 = vsyncpa [#allocation13], 0  ;;  %s835_s13 = smov [#allocation5]   ;;  %s671_s17 = scalar_lea.hbm %s1032_s1, 512 }
   0x5   :  { %s36_s14 = sshll.u32 %s835_s13, 4  ;;  %p672_p0 = scmp.ne.s32.totalorder %s1032_s1, %s671_s17  ;;  %s37_s14 = int_to_ptr.vmem [resolvable:$true] %s36_s14 }
   0x6   :  { %p675_p1 = scmp.lt.u32.totalorder %s671_s17, %s1032_s1 }
   0x8   :  { %p677_p2 = pnand %p675_p1, %p672_p0 }
   0xa   :  { %680 = shalt.err (!%p677_p2)
}
   0xb   :  { %s681_s22 = scalar_lea.vmem %s37_s14, 512  ;;  %p686_p4 = scmp.lt.s32.totalorder %s37_s14, %s37_s14 }
   0xc   :  { %p682_p3 = scmp.ne.s32.totalorder %s37_s14, %s681_s22  ;;  %p687_p5 = scmp.lt.s32.totalorder %s681_s22, %s681_s22 }
   0xe   :  { %p688_p6 = por %p687_p5, %p686_p4 }
  0x10   :  { %p689_p7 = pnand %p688_p6, %p682_p3 }
  0x12   :  { %692 = shalt.err (!%p689_p7)
}
  0x13   :  { %s836_s23 = smov 128   ;;  %s837_s24 = smov 8  }
  0x14   :  { %42 = dma.hbm_to_vmem [thread:$0]  %s1032_s1, 512, %s37_s14, [#allocation6], %s836_s23, %s836_s23, %s837_s24  }
  0x15   :  { %s838_s27 = smov [#allocation8]   ;;  %s839_s29 = smov [#allocation2]  }
  0x16   :  { %s64_s28 = sshll.u32 %s838_s27, 4  ;;  %s27_s30 = sshll.u32 %s839_s29, 4  ;;  %s65_s28 = int_to_ptr.vmem [resolvable:$true] %s64_s28  ;;  %s28_s30 = int_to_ptr.vmem [resolvable:$true] %s27_s30 }
  0x17   :  { %s693_s13 = scalar_lea.hbm %s1036_s5, 1024 }
  0x18   :  { %p694_p8 = scmp.ne.s32.totalorder %s1036_s5, %s693_s13  ;;  %p697_p9 = scmp.lt.u32.totalorder %s693_s13, %s1036_s5 }
  0x1a   :  { %p699_p10 = pnand %p697_p9, %p694_p8 }
  0x1c   :  { %702 = shalt.err (!%p699_p10)
}
  0x1d   :  { %s703_s1 = scalar_lea.vmem %s65_s28, 1024  ;;  %p708_p12 = scmp.lt.s32.totalorder %s65_s28, %s65_s28 }
  0x1e   :  { %p704_p11 = scmp.ne.s32.totalorder %s65_s28, %s703_s1  ;;  %p709_p13 = scmp.lt.s32.totalorder %s703_s1, %s703_s1 }
  0x20   :  { %p710_p0 = por %p709_p13, %p708_p12 }
  0x22   :  { %p711_p1 = pnand %p710_p0, %p704_p11 }
  0x24   :  { %714 = shalt.err (!%p711_p1)
}
  0x25   :  { %70 = dma.hbm_to_vmem [thread:$0]  %s1036_s5, 1024, %s65_s28, [#allocation9], %s836_s23, %s836_s23, %s837_s24  }
  0x26   :  { %s715_s22 = scalar_lea.hbm %s1031_s0, 128 }
  0x27   :  { %p716_p2 = scmp.ne.s32.totalorder %s1031_s0, %s715_s22  ;;  %p719_p3 = scmp.lt.u32.totalorder %s715_s22, %s1031_s0 }
  0x29   :  { %p721_p4 = pnand %p719_p3, %p716_p2 }
  0x2b   :  { %724 = shalt.err (!%p721_p4)
}
  0x2c   :  { %s725_s11 = scalar_lea.vmem %s28_s30, 128  ;;  %p730_p6 = scmp.lt.s32.totalorder %s28_s30, %s28_s30 }
  0x2d   :  { %p726_p5 = scmp.ne.s32.totalorder %s28_s30, %s725_s11  ;;  %p731_p7 = scmp.lt.s32.totalorder %s725_s11, %s725_s11 }
  0x2f   :  { %p732_p8 = por %p731_p7, %p730_p6 }
  0x31   :  { %p733_p9 = pnand %p732_p8, %p726_p5 }
  0x33   :  { %736 = shalt.err (!%p733_p9)
}
  0x34   :  { %30 = dma.hbm_to_vmem [thread:$0]  %s1031_s0, 128, %s28_s30, [#allocation3]  }
  0x35   :  { %s840_s12 = smov [#allocation7]   ;;  %s841_s15 = smov [#allocation10]  }
  0x36   :  { %s50_s13 = sshll.u32 %s840_s12, 4  ;;  %s78_s16 = sshll.u32 %s841_s15, 4  ;;  %s51_s13 = int_to_ptr.vmem [resolvable:$true] %s50_s13  ;;  %s79_s16 = int_to_ptr.vmem [resolvable:$true] %s78_s16 }
  0x37   :  { %s737_s1 = scalar_lea.hbm %s1034_s3, 1024 }
  0x38   :  { %p738_p10 = scmp.ne.s32.totalorder %s1034_s3, %s737_s1  ;;  %p741_p11 = scmp.lt.u32.totalorder %s737_s1, %s1034_s3 }
  0x3a   :  { %p743_p12 = pnand %p741_p11, %p738_p10 }
  0x3c   :  { %746 = shalt.err (!%p743_p12)
}
  0x3d   :  { %s747_s0 = scalar_lea.vmem %s51_s13, 1024  ;;  %p752_p0 = scmp.lt.s32.totalorder %s51_s13, %s51_s13 }
  0x3e   :  { %p748_p13 = scmp.ne.s32.totalorder %s51_s13, %s747_s0  ;;  %p753_p1 = scmp.lt.s32.totalorder %s747_s0, %s747_s0 }
  0x40   :  { %p754_p2 = por %p753_p1, %p752_p0 }
  0x42   :  { %p755_p3 = pnand %p754_p2, %p748_p13 }
  0x44   :  { %758 = shalt.err (!%p755_p3)
}
  0x45   :  { %56 = dma.hbm_to_vmem [thread:$0]  %s1034_s3, 1024, %s51_s13, [#allocation6], %s836_s23, %s836_s23, %s837_s24  }
  0x46   :  { %s759_s27 = scalar_lea.hbm %s1038_s7, 1024 }
  0x47   :  { %p760_p4 = scmp.ne.s32.totalorder %s1038_s7, %s759_s27  ;;  %p763_p5 = scmp.lt.u32.totalorder %s759_s27, %s1038_s7 }
  0x49   :  { %p765_p6 = pnand %p763_p5, %p760_p4 }
  0x4b   :  { %768 = shalt.err (!%p765_p6)
}
  0x4c   :  { %s769_s12 = scalar_lea.vmem %s79_s16, 1024  ;;  %p774_p8 = scmp.lt.s32.totalorder %s79_s16, %s79_s16 }
  0x4d   :  { %p770_p7 = scmp.ne.s32.totalorder %s79_s16, %s769_s12  ;;  %p775_p9 = scmp.lt.s32.totalorder %s769_s12, %s769_s12 }
  0x4f   :  { %p776_p10 = por %p775_p9, %p774_p8 }
  0x51   :  { %p777_p11 = pnand %p776_p10, %p770_p7 }
  0x53   :  { %780 = shalt.err (!%p777_p11)
}
  0x54   :  { %84 = dma.hbm_to_vmem [thread:$0]  %s1038_s7, 1024, %s79_s16, [#allocation9], %s836_s23, %s836_s23, %s837_s24  }
  0x55   :  { %825 = dma.done.wait [#allocation3], 128  }
  0x56   :  { %826 = vsyncadd [#allocation3], 4294967168 }
  0x57   :  { %827 = dma.done.wait [#allocation6], 1536  }
  0x58   :  { %828 = vsyncadd [#allocation6], 4294965760 }
  0x59   :  { %829 = dma.done.wait [#allocation9], 2048  }
  0x5a   :  { %830 = vsyncadd [#allocation9], 4294965248  ;;  %v842_v0 = vmov 0.0|0.0   ;;  %vm843_vm0 = vmmov 0   ;;  %v844_v1 = vmov 0.0   ;;  %v103_v2 = vld [vmem:[#allocation5] sm:$0xff] }
  0x5b   :  { %609 = vmatprep.subr.bf16.mxu0 %v842_v0  ;;  %549 = vmatprep.mubr.msk.f32.mxu0 %vm843_vm0, %v844_v1  ;;  %v104_v3 = vld [vmem:[#allocation5 + $0x8] sm:$0xff]  ;;  %v105_v4 = vld [vmem:[#allocation5 + $0x10] sm:$0xff]  ;;  %v106_v6 = vld [vmem:[#allocation5 + $0x18] sm:$0xff]  ;;  %vm114_vm1 = vcmask 261120   ;;  %vm204_vm2 = vcmask 523264   ;;  %s845_s1 = smov [#allocation11]  }
  0x5c   :  { %615 = vmatprep.subr.bf16.mxu1 %v842_v0  ;;  %568 = vmatprep.mubr.msk.f32.mxu1 %vm843_vm0, %v844_v1  ;;  %v610_v5 = vpack.c.bf16 %v104_v3, %v103_v2  ;;  %v189_v7 = vld [vmem:[#allocation7] sm:$0xff]  ;;  %v190_v8 = vld [vmem:[#allocation7 + $0x8] sm:$0xff]  ;;  %v613_v9 = vpack.c.bf16 %v106_v6, %v105_v4  ;;  %v102_v11 = vld [vmem:[#allocation2] sm:$0xff]  ;;  %s476_s14 = sshll.u32 %s845_s1, 4  ;;  %s477_s14 = int_to_ptr.vmem [resolvable:$true] %s476_s14 }
  0x5d   :  { %v616_v10 = vpack.c.bf16 %v190_v8, %v189_v7  ;;  %v191_v12 = vld [vmem:[#allocation7 + $0x10] sm:$0xff]  ;;  %v192_v13 = vld [vmem:[#allocation7 + $0x18] sm:$0xff]  ;;  %v193_v15 = vld [vmem:[#allocation7 + $0x20] sm:$0xff]  ;;  %p786_p13 = scmp.lt.s32.totalorder %s477_s14, %s477_s14 }
  0x5e   :  { %611 = vmatpush3.bf16.msra.mxu0 %v610_v5  ;;  %v619_v14 = vpack.c.bf16 %v192_v13, %v191_v12  ;;  %v194_v16 = vld [vmem:[#allocation7 + $0x28] sm:$0xff]  ;;  %v195_v18 = vld [vmem:[#allocation7 + $0x30] sm:$0xff]  ;;  %v196_v19 = vld [vmem:[#allocation7 + $0x38] sm:$0xff] }
  0x5f   :  { %612 = vmatprep.subr.bf16.mxu0 %v842_v0  ;;  %617 = vmatpush3.bf16.msra.mxu1 %v616_v10  ;;  %v622_v17 = vpack.c.bf16 %v194_v16, %v193_v15  ;;  %v625_v20 = vpack.c.bf16 %v196_v19, %v195_v18  ;;  %v279_v21 = vld [vmem:[#allocation8] sm:$0xff]  ;;  %v280_v22 = vld [vmem:[#allocation8 + $0x8] sm:$0xff]  ;;  %v501_v24 = vld [vmem:[%s1033_s2] ss:$0 sm:$0xff] }
  0x60   :  { %618 = vmatprep.subr.bf16.mxu1 %v842_v0  ;;  %v628_v23 = vpack.c.bf16 %v280_v22, %v279_v21  ;;  %v367_v28 = vld [vmem:[#allocation10] sm:$0xff]  ;;  %v368_v29 = vld [vmem:[#allocation10 + $0x8] sm:$0xff]  ;;  %v281_v32 = vld [vmem:[#allocation8 + $0x10] sm:$0xff] }
  0x61   :  { %v640_v30 = vpack.c.bf16 %v368_v29, %v367_v28  ;;  %v282_v33 = vld [vmem:[#allocation8 + $0x18] sm:$0xff]  ;;  %v369_v34 = vld [vmem:[#allocation10 + $0x10] sm:$0xff]  ;;  %v283_v38 = vld [vmem:[#allocation8 + $0x20] sm:$0xff] }
  0x62   :  { %614 = vmatpush3.bf16.msra.mxu0 %v613_v9  ;;  %v631_v35 = vpack.c.bf16 %v282_v33, %v281_v32  ;;  %v370_v36 = vld [vmem:[#allocation10 + $0x18] sm:$0xff]  ;;  %v284_v39 = vld [vmem:[#allocation8 + $0x28] sm:$0xff]  ;;  %v371_v40 = vld [vmem:[#allocation10 + $0x20] sm:$0xff] }
  0x63   :  { %627 = vmatprep.subr.bf16.mxu0 %v842_v0  ;;  %620 = vmatpush3.bf16.msra.mxu1 %v619_v14  ;;  %v643_v37 = vpack.c.bf16 %v370_v36, %v369_v34  ;;  %v634_v41 = vpack.c.bf16 %v284_v39, %v283_v38  ;;  %v372_v42 = vld [vmem:[#allocation10 + $0x28] sm:$0xff]  ;;  %v285_v43 = vld [vmem:[#allocation8 + $0x30] sm:$0xff]  ;;  %v286_v44 = vld [vmem:[#allocation8 + $0x38] sm:$0xff] }
  0x64   :  { %621 = vmatprep.subr.bf16.mxu1 %v842_v0  ;;  %v646_v45 = vpack.c.bf16 %v372_v42, %v371_v40  ;;  %v373_v46 = vld [vmem:[#allocation10 + $0x30] sm:$0xff]  ;;  %v374_v47 = vld [vmem:[#allocation10 + $0x38] sm:$0xff]  ;;  %v637_v48 = vpack.c.bf16 %v286_v44, %v285_v43 }
  0x65   :  { %550 = vmatmul.mubr.msk.f32.vlgmr.msra.gmra.mrb[0].mxu0 %vm114_vm1, %v102_v11  ;;  %v649_v49 = vpack.c.bf16 %v374_v47, %v373_v46  ;;  %v503_v50 = vld [vmem:[%s1035_s4] ss:$0 sm:$0xff]  ;;  %s781_s4 = scalar_lea.vmem %s477_s14, 128 }
  0x66   :  { %587 = vmatprep.mubr.msk.f32.mxu0 %vm843_vm0, %v844_v1  ;;  %629 = vmatpush3.bf16.msra.mxu0 %v628_v23  ;;  %v505_v55 = vld [vmem:[%s1037_s6] ss:$0 sm:$0xff]  ;;  %p782_p12 = scmp.ne.s32.totalorder %s477_s14, %s781_s4  ;;  %p787_p0 = scmp.lt.s32.totalorder %s781_s4, %s781_s4 }
  0x67   :  { %623 = vmatpush3.bf16.msra.mxu1 %v622_v17  ;;  %630 = vmatprep.subr.bf16.mxu0 %v842_v0  ;;  %v507_v56 = vld [vmem:[%s1039_s8] ss:$0 sm:$0xff] }
  0x68   :  { %624 = vmatprep.subr.bf16.mxu1 %v842_v0  ;;  %p788_p1 = por %p787_p0, %p786_p13 }
  0x6a   :  { %632 = vmatpush3.bf16.msra.mxu0 %v631_v35  ;;  %p789_p2 = pnand %p788_p1, %p782_p12 }
  0x6b   :  { %626 = vmatpush3.bf16.msra.mxu1 %v625_v20  ;;  %633 = vmatprep.subr.bf16.mxu0 %v842_v0 }
  0x6c   :  { %639 = vmatprep.subr.bf16.mxu1 %v842_v0 }
  0x6e   :  { %635 = vmatpush3.bf16.msra.mxu0 %v634_v41 }
  0x6f   :  { %636 = vmatprep.subr.bf16.mxu0 %v842_v0 }
  0x72   :  { %638 = vmatpush3.bf16.msra.mxu0 %v637_v48 }
 0x138   :  { %v184_v25 = vpop.f32.mrb[0].mxu0 }
 0x139   :  { %v185_v26 = vadd.f32 %v501_v24, %v184_v25  ;;  %v551_v27 = vpop.f32.mrb[1].mxu0 }
 0x13b   :  { %663 = vtanh.f32 %v185_v26 }
 0x145   :  { %v664_v31 = vpop.eup %663 }
 0x146   :  { %569 = vmatmul.mubr.msk.f32.vlgmr.msra.gmra.mrb[0].mxu1 %vm204_vm2, %v664_v31 }
 0x147   :  { %641 = vmatpush3.bf16.msra.mxu1 %v640_v30  ;;  %606 = vmatprep.mubr.msk.f32.mxu1 %vm843_vm0, %v844_v1 }
 0x148   :  { %642 = vmatprep.subr.bf16.mxu1 %v842_v0 }
 0x14b   :  { %644 = vmatpush3.bf16.msra.mxu1 %v643_v37 }
 0x14c   :  { %645 = vmatprep.subr.bf16.mxu1 %v842_v0 }
 0x14f   :  { %647 = vmatpush3.bf16.msra.mxu1 %v646_v45 }
 0x150   :  { %648 = vmatprep.subr.bf16.mxu1 %v842_v0 }
 0x153   :  { %650 = vmatpush3.bf16.msra.mxu1 %v649_v49 }
 0x219   :  { %v274_v51 = vpop.f32.mrb[0].mxu1 }
 0x21a   :  { %v275_v52 = vadd.f32 %v503_v50, %v274_v51  ;;  %v570_v53 = vpop.f32.mrb[1].mxu1 }
 0x21c   :  { %665 = vtanh.f32 %v275_v52 }
 0x226   :  { %v666_v54 = vpop.eup %665 }
 0x227   :  { %588 = vmatmul.mubr.msk.f32.vlgmr.msra.gmra.mrb[2].mxu0 %vm204_vm2, %v666_v54  ;;  %607 = vmatmul.mubr.msk.f32.vlgmr.msra.gmra.mrb[2].mxu1 %vm204_vm2, %v666_v54 }
 0x2fa   :  { %v363_v57 = vpop.f32.mrb[2].mxu0  ;;  %v448_v58 = vpop.f32.mrb[2].mxu1 }
 0x2fb   :  { %v364_v59 = vadd.f32 %v505_v55, %v363_v57  ;;  %v449_v60 = vadd.f32 %v507_v56, %v448_v58  ;;  %v589_v61 = vpop.f32.mrb[3].mxu0  ;;  %v608_v62 = vpop.f32.mrb[3].mxu1 }
 0x2fd   :  { %468 = vst [vmem:[#allocation11] sm:$0xff] %v364_v59  ;;  %v453_v63 = vand.u32 2147483647, %v449_v60 }
 0x2fe   :  { %792 = shalt.err (!%p789_p2)
}
 0x2ff   :  { %s793_s19 = scalar_lea.hbm %s1040_s9, 128 }
 0x300   :  { %p794_p3 = scmp.ne.s32.totalorder %s1040_s9, %s793_s19  ;;  %p797_p4 = scmp.lt.u32.totalorder %s793_s19, %s1040_s9 }
 0x302   :  { %p799_p5 = pnand %p797_p4, %p794_p3 }
 0x304   :  { %802 = shalt.err (!%p799_p5)
}
 0x305   :  { %479 = dma.vmem_to_hbm [thread:$0]  %s477_s14, 128, %s1040_s9, [#allocation4]   ;;  %v454_v0 = vsub.f32 0.0, %v453_v63  ;;  %v452_v10 = vmax.f32 %v449_v60, 0.0 }
 0x306   :  { %s846_s26 = smov [#allocation12]  }
 0x307   :  { %v455_v1 = vmul.f32 1.442695, %v454_v0  ;;  %s486_s27 = sshll.u32 %s846_s26, 4  ;;  %s487_s27 = int_to_ptr.vmem [resolvable:$true] %s486_s27 }
 0x308   :  { %s803_s9 = scalar_lea.vmem %s487_s27, 128  ;;  %p808_p7 = scmp.lt.s32.totalorder %s487_s27, %s487_s27 }
 0x309   :  { %667 = vpow2.f32 %v455_v1  ;;  %p804_p6 = scmp.ne.s32.totalorder %s487_s27, %s803_s9  ;;  %p809_p8 = scmp.lt.s32.totalorder %s803_s9, %s803_s9 }
 0x30b   :  { %p810_p9 = por %p809_p8, %p808_p7 }
 0x30d   :  { %p811_p10 = pnand %p810_p9, %p804_p6 }
 0x313   :  { %v668_v2 = vpop.eup %667 }
 0x314   :  { %v457_v3 = vadd.f32 1.0, %v668_v2  ;;  %v460_v4 = vmul.f32 -0.5, %v668_v2  ;;  %v463_v6 = vand.u32 2147483647, %v668_v2 }
 0x316   :  { %669 = vlog2.f32 %v457_v3  ;;  %v461_v5 = vadd.f32 1.0, %v460_v4  ;;  %vm464_vm3 = vcmp.lt.f32.partialorder %v463_v6, 0.0004427343 }
 0x318   :  { %v462_v9 = vmul.f32 %v668_v2, %v461_v5 }
 0x320   :  { %v670_v7 = vpop.eup %669 }
 0x321   :  { %v459_v8 = vmul.f32 0.6931472, %v670_v7 }
 0x323   :  { %v465_v11 = vsel %vm464_vm3, %v462_v9, %v459_v8 }
 0x324   :  { %v466_v12 = vadd.f32 %v465_v11, %v452_v10 }
 0x326   :  { %v467_v13 = vmax.f32 %v466_v12, 0.0001 }
 0x328   :  { %469 = vst [vmem:[#allocation12] sm:$0xff] %v467_v13 }
 0x329   :  { %814 = shalt.err (!%p811_p10)
}
 0x32a   :  { %s815_s5 = scalar_lea.hbm %s1041_s10, 128 }
 0x32b   :  { %p816_p11 = scmp.ne.s32.totalorder %s1041_s10, %s815_s5  ;;  %p819_p12 = scmp.lt.u32.totalorder %s815_s5, %s1041_s10 }
 0x32d   :  { %p821_p13 = pnand %p819_p12, %p816_p11 }
 0x32f   :  { %824 = shalt.err (!%p821_p13)
}
 0x330   :  { %489 = dma.vmem_to_hbm [thread:$0]  %s487_s27, 128, %s1041_s10, [#allocation13]  }
 0x331   :  { %831 = dma.done.wait [#allocation4], 128  }
 0x332   :  { %832 = vsyncadd [#allocation4], 4294967168 }
 0x333   :  { %833 = dma.done.wait [#allocation13], 128  }
 0x334   :  { %834 = vsyncadd [#allocation13], 4294967168 }
 0x335   :  { %496 = vsyncpa [#allocation3], 1 }
 0x336   :  { %497 = vsyncpa [#allocation6], 1 }
 0x337   :  { %498 = vsyncpa [#allocation9], 1 }
 0x338   :  { %499 = vsyncpa [#allocation4], 1 }
 0x339   :  { %500 = vsyncpa [#allocation13], 1 }

</bundles_post_ra>
